<compile_context>
chip_gen: v7x
topology: tpu7x:2x2x1
jax: 0.10.0
libtpu: 0.0.40
codegen_flags: <defaults>
</compile_context>

<pallas_src>
import numpy as np
import jax
import jax.numpy as jnp
from jax import lax
from jax.experimental import pallas as pl
from jax.experimental.pallas import tpu as pltpu


def _round_up(x, m):
    return (x + m - 1) // m * m


def _cdiv(a, b):
    return -(-a // b)


def _tpu_caps():
    """Generation-aware tile caps / VMEM budget (conservative fallback)."""
    kind = ""
    try:
        kind = jax.devices()[0].device_kind.lower()
    except Exception:
        pass
    if "v5p" in kind:
        return {"max_row_tile": 512, "vmem_cap": 100 << 20, "min_parallel": 1}
    if "v5 lite" in kind or "v5lite" in kind or "v5e" in kind or "v5" in kind:
        return {"max_row_tile": 128, "vmem_cap": 96 << 20, "min_parallel": 1}
    if "v6" in kind or "trillium" in kind:
        return {"max_row_tile": 512, "vmem_cap": 100 << 20, "min_parallel": 1}
    if "v7" in kind:
        return {"max_row_tile": 256, "vmem_cap": 48 << 20, "min_parallel": 2}
    # unknown: assume v7x-like limits (tightest)
    return {"max_row_tile": 256, "vmem_cap": 48 << 20, "min_parallel": 2}


# ----------------------------------------------------------------------------
# Kernel 1: fused left/right sigmoid (+ spatial sums) over (TB, HWp) blocks
# ----------------------------------------------------------------------------
def _sigmoid_lr_kernel(lx_ref, rx_ref, lp_ref, rp_ref, lsum_ref, rsum_ref):
    lp = jax.nn.sigmoid(lx_ref[...].astype(jnp.float32))
    rp = jax.nn.sigmoid(rx_ref[...].astype(jnp.float32))
    lp_ref[...] = lp.astype(lp_ref.dtype)
    rp_ref[...] = rp.astype(rp_ref.dtype)
    # Fused spatial sums (XLU lane reduce; saves a full HBM re-read downstream).
    lsum_ref[...] = jnp.sum(lp, axis=-1, keepdims=True)
    rsum_ref[...] = jnp.sum(rp, axis=-1, keepdims=True)


def gather_sigmoid_lr(left_logits, right_logits, labels):
    """left/right logits: (N, C, H, W); labels: (N,) int.

    Returns (padded) device arrays:
      lprob_p, rprob_p : (Np, HWp) f32  -- sigmoid(logits)[i, labels[i]] flattened,
                                           rows >= N and cols >= HW are exactly 0.
      lsum, rsum       : (Np,)     f32  -- spatial sums (for filter_empty / areas).
      (N, HW)                           -- valid extents.
    """
    N, C, H, W = left_logits.shape
    HW = H * W
    labels = jnp.clip(labels.astype(jnp.int32), 0, C - 1)  # bounds safety

    # Class-channel gather in the wrapper: bulk XLA gather (pure memory movement).
    idx = labels[:, None, None]
    lsel = jnp.take_along_axis(left_logits.reshape(N, C, HW), idx, axis=1)[:, 0]
    rsel = jnp.take_along_axis(right_logits.reshape(N, C, HW), idx, axis=1)[:, 0]

    caps = _tpu_caps()
    HWp = _round_up(HW, 128)
    Np8 = _round_up(N, 8)

    # Balanced row-tile selection: avoid round_up over-padding and give >=2
    # parallel grid steps on v7x when there are enough rows.
    tb_base = max(8, min(caps["max_row_tile"], Np8))
    grid_n = _cdiv(Np8, tb_base)
    grid_n = max(1, min(max(grid_n, caps["min_parallel"]), Np8 // 8))
    TB = _round_up(_cdiv(Np8, grid_n), 8)

    # VMEM fit: 2 inputs + 2 big outputs (f32) + 2 tiny sum outputs, x2 buffers.
    def k1_bytes(tb):
        return 2 * (4 * tb * HWp * 4 + 2 * tb * 4)

    budget = int(caps["vmem_cap"] * 0.9)
    while TB > 8 and k1_bytes(TB) > budget:
        TB = max(8, _round_up(TB // 2, 8))
    grid_n = _cdiv(Np8, TB)
    Np = grid_n * TB
    vmem_limit = int(min(caps["vmem_cap"], max(k1_bytes(TB) + (4 << 20), 32 << 20)))

    # Pad with a large negative logit -> sigmoid(pad) == 0, so the fused sums
    # over padded columns/rows stay exact.
    NEG = -1e4
    lsel_p = jnp.pad(lsel, ((0, Np - N), (0, HWp - HW)), constant_values=NEG)
    rsel_p = jnp.pad(rsel, ((0, Np - N), (0, HWp - HW)), constant_values=NEG)

    row_spec = lambda: pl.BlockSpec((TB, HWp), lambda i: (i, 0))
    sum_spec = lambda: pl.BlockSpec((TB, 1), lambda i: (i, 0))

    lprob_p, rprob_p, lsum_p, rsum_p = pl.pallas_call(
        _sigmoid_lr_kernel,
        grid_spec=pltpu.PrefetchScalarGridSpec(
            num_scalar_prefetch=0,
            grid=(grid_n,),
            in_specs=[row_spec(), row_spec()],
            out_specs=(row_spec(), row_spec(), sum_spec(), sum_spec()),
        ),
        out_shape=(
            jax.ShapeDtypeStruct((Np, HWp), jnp.float32),
            jax.ShapeDtypeStruct((Np, HWp), jnp.float32),
            jax.ShapeDtypeStruct((Np, 1), jnp.float32),
            jax.ShapeDtypeStruct((Np, 1), jnp.float32),
        ),
        compiler_params=pltpu.CompilerParams(
            dimension_semantics=("parallel",),
            vmem_limit_bytes=vmem_limit),
    )(lsel_p, rsel_p)

    return lprob_p, rprob_p, lsum_p[:, 0], rsum_p[:, 0], (N, HW)


# ----------------------------------------------------------------------------
# Kernel 2: batched pairwise mask "IoU" on the MXU
#   iou[s, i, j] = sum(mask_i * mask_j) / (sum(mask_i) + 1e-4)
# ----------------------------------------------------------------------------
def _pairwise_iou_kernel(m_ref, mt_ref, inv_ref, iou_ref):
    # m_ref: (TM, HWp) bf16 row tile; mt_ref: (HWp, TN) bf16 pre-transposed RHS;
    # inv_ref: (TM, 1) f32 precomputed 1/(area_i + 1e-4).
    inter = lax.dot_general(
        m_ref[...], mt_ref[...],
        dimension_numbers=(((1,), (0,)), ((), ())),
        preferred_element_type=jnp.float32)            # (TM, TN) f32 accumulate
    iou_ref[...] = inter * inv_ref[...]


def _pick_iou_tile(Mp, HWp, caps):
    budget = int(caps["vmem_cap"] * 0.9)

    def bytes_for(t):
        # lhs bf16 + rhs bf16 + inv f32 + out f32, x2 pipeline buffers
        return 2 * (t * HWp * 2 + HWp * t * 2 + t * 4 + t * t * 4)

    tile = 128
    for t in (512, 256, 128):
        if t > max(caps["max_row_tile"], 128):
            continue
        if Mp % t != 0:
            continue
        if bytes_for(t) <= budget:
            tile = t
            break
    # TODO(synk): if even 128-wide tiles exceed the VMEM budget (enormous HW),
    # K-tile HWp with an f32 accumulator + pl.when init/finalize.
    vmem_limit = int(min(caps["vmem_cap"], max(bytes_for(tile) + (4 << 20), 32 << 20)))
    return tile, vmem_limit


def _pairwise_iou_padded(masks_bf16, areas_f32):
    """masks_bf16: (S, Mp, HWp) bf16 (Mp % 128 == 0, HWp % 128 == 0);
    areas_f32: (S, Mp) f32.  Returns (S, Mp, Mp) f32."""
    S, Mp, HWp = masks_bf16.shape
    caps = _tpu_caps()
    T, vmem_limit = _pick_iou_tile(Mp, HWp, caps)

    mt = jnp.transpose(masks_bf16, (0, 2, 1))                 # one XLA transpose
    inv = (1.0 / (areas_f32.astype(jnp.float32) + 1e-4))[..., None]  # exact f32

    grid = (S, Mp // T, Mp // T)
    iou = pl.pallas_call(
        _pairwise_iou_kernel,
        grid_spec=pltpu.PrefetchScalarGridSpec(
            num_scalar_prefetch=0,
            grid=grid,
            in_specs=[
                pl.BlockSpec((None, T, HWp), lambda s, i, j: (s, i, 0)),
                pl.BlockSpec((None, HWp, T), lambda s, i, j: (s, 0, j)),
                pl.BlockSpec((None, T, 1), lambda s, i, j: (s, i, 0)),
            ],
            out_specs=pl.BlockSpec((None, T, T), lambda s, i, j: (s, i, j)),
        ),
        out_shape=jax.ShapeDtypeStruct((S, Mp, Mp), jnp.float32),
        compiler_params=pltpu.CompilerParams(
            dimension_semantics=("parallel", "parallel", "parallel"),
            vmem_limit_bytes=vmem_limit),
    )(masks_bf16, mt, inv)
    return iou


def pairwise_mask_iou_batched(masks):
    """masks: (S, M, HW) f32.  Returns (S, M, M) with
    [s, i, j] = inter(mask_i, mask_j) / (area_i + 1e-4)."""
    S, M, HW = masks.shape
    HWp = _round_up(HW, 128)
    Mp = _round_up(max(M, 1), 128)                       # lane-dense output
    m = jnp.pad(masks.astype(jnp.float32), ((0, 0), (0, Mp - M), (0, HWp - HW)))
    areas = jnp.sum(m, axis=-1)                          # f32 exact areas
    return _pairwise_iou_padded(m.astype(jnp.bfloat16), areas)[:, :M, :M]


# ----------------------------------------------------------------------------
# Host-side glue mirroring the PyTorch module's control flow
# ----------------------------------------------------------------------------
def _greedy_nms_from_iou(iou, n, thresh):
    """Greedy mask NMS over a precomputed (n, n) IoU matrix in score-sorted
    order.  Returns kept positions (indices into the *sorted* order, like the
    torch module) or None if n <= 1."""
    if n <= 1:
        return None
    keeps = []
    cur = np.arange(n)
    # TODO(synk): data-dependent greedy while-loop over a shrinking set has no
    # fixed-shape Pallas equivalent; runs on host over the precomputed IoU matrix.
    while len(cur) > 1:
        keeps.append(cur[0])
        keep_mask = iou[cur[0], cur[1:]] < thresh
        cur = cur[1:][keep_mask]
        if len(cur) == 1:
            keeps.append(cur[0])
            break
    return np.asarray(keeps)


def mask_post_processor_forward(left_logits, right_logits, labels,
                                boxes_per_image, scores,
                                filter_empty=True, apply_mask_nms=True,
                                mask_nms_thresh=0.9):
    """Reproduces MaskPostProcessor.forward (separate_pred=False, masker=None).

    Returns a list (one per image) of dicts with 'mask', 'src_mask' (device
    jnp arrays, like torch tensors in BoxList fields), 'scores', 'keep_idx'.
    Only small arrays (scores, per-mask sums, IoU matrices) cross host<->device.
    """
    N, C, H, W = left_logits.shape
    HW = H * W

    lprob_p, rprob_p, lsum_full, rsum_full, _ = gather_sigmoid_lr(
        left_logits, right_logits, labels)
    Np = lprob_p.shape[0]

    # Only tiny arrays cross PCIe here.
    lsum_np = np.asarray(jax.block_until_ready(lsum_full))[:N]
    rsum_np = np.asarray(rsum_full)[:N]
    scores_np = np.asarray(scores)

    # Per-image split + filter_empty (BoxList bookkeeping on host, indices only).
    per_image = []
    start = 0
    for nb in boxes_per_image:
        g = np.arange(start, start + nb)
        start += nb
        if filter_empty:
            valid = (lsum_np[g] > 0) & (rsum_np[g] > 0)
            g = g[valid]
        per_image.append(g)

    if apply_mask_nms:
        entries = []
        for img_i, g in enumerate(per_image):
            if len(g) <= 1:
                continue  # torch mask_nms returns None -> result kept as-is
            rank = np.argsort(-scores_np[g], kind="stable")
            entries.append((img_i, g[rank]))
        if entries:
            m_max = max(len(sg) for _, sg in entries)
            Mp = _round_up(m_max, 128)                  # lane-dense IoU output
            S = 2 * len(entries)                        # left + right per image
            gidx = np.zeros((S, Mp), dtype=np.int32)    # pad with row 0 (valid)
            for k, (img_i, sg) in enumerate(entries):
                n = len(sg)
                gidx[2 * k, :n] = sg                    # left rows
                gidx[2 * k + 1, :n] = sg + Np           # right rows (offset)
            idx_dev = jnp.asarray(gidx)

            # Device-resident gather of score-sorted masks (no host round trip).
            probs_all = jnp.concatenate([lprob_p, rprob_p], axis=0)   # (2Np, HWp)
            sums_all = jnp.concatenate([lsum_full, rsum_full], axis=0)
            masks = jnp.take(probs_all, idx_dev, axis=0)              # (S, Mp, HWp)
            areas = jnp.take(sums_all, idx_dev, axis=0)               # (S, Mp)
            iou = _pairwise_iou_padded(masks.astype(jnp.bfloat16), areas)
            iou_np = np.asarray(jax.block_until_ready(iou))           # small

            for k, (img_i, sg) in enumerate(entries):
                n = len(sg)
                lkeep = _greedy_nms_from_iou(iou_np[2 * k, :n, :n], n, mask_nms_thresh)
                rkeep = _greedy_nms_from_iou(iou_np[2 * k + 1, :n, :n], n, mask_nms_thresh)
                if lkeep is None or rkeep is None:
                    continue
                inter = np.asarray(
                    sorted(set(lkeep.tolist()) & set(rkeep.tolist())),
                    dtype=np.int64)
                # NOTE: mirrors the torch module, which applies sorted-order keep
                # indices to the UNSORTED (post-filter) result.
                per_image[img_i] = per_image[img_i][inter]

    results = []
    for g in per_image:
        gi = jnp.asarray(g.astype(np.int32))
        lp = jnp.take(lprob_p, gi, axis=0)[:, :HW].reshape(-1, 1, H, W)
        rp = jnp.take(rprob_p, gi, axis=0)[:, :HW].reshape(-1, 1, H, W)
        results.append({"mask": lp, "src_mask": rp,
                        "scores": scores_np[g], "keep_idx": g})
    return results


# ----------------------------------------------------------------------------
if __name__ == "__main__":
    key = jax.random.PRNGKey(0)
    N, C, H, W = 8, 4, 16, 16          # 2 images x 4 boxes, 4 classes, 16x16 masks
    boxes_per_image = [4, 4]
    HW = H * W

    k1, k2, k3, k4 = jax.random.split(key, 4)
    left_logits = jax.random.normal(k1, (N, C, H, W), dtype=jnp.float32)
    right_logits = jax.random.normal(k2, (N, C, H, W), dtype=jnp.float32)
    labels = jax.random.randint(k3, (N,), 1, C).astype(jnp.int32)
    scores = jax.random.uniform(k4, (N,), dtype=jnp.float32)

    # --- kernel 1: fused gather + sigmoid + spatial sums ---
    lprob_p, rprob_p, lsum, rsum, _ = gather_sigmoid_lr(left_logits, right_logits, labels)
    jax.block_until_ready((lprob_p, rprob_p, lsum, rsum))

    ref_lprob = jax.nn.sigmoid(left_logits)[jnp.arange(N), labels]   # (N, H, W)
    ref_rprob = jax.nn.sigmoid(right_logits)[jnp.arange(N), labels]
    np.testing.assert_allclose(np.asarray(lprob_p)[:N, :HW],
                               np.asarray(ref_lprob).reshape(N, HW),
                               rtol=1e-6, atol=1e-6)
    np.testing.assert_allclose(np.asarray(rprob_p)[:N, :HW],
                               np.asarray(ref_rprob).reshape(N, HW),
                               rtol=1e-6, atol=1e-6)
    np.testing.assert_allclose(np.asarray(lsum)[:N],
                               np.asarray(ref_lprob).reshape(N, -1).sum(-1),
                               rtol=1e-5, atol=1e-5)
    np.testing.assert_allclose(np.asarray(rsum)[:N],
                               np.asarray(ref_rprob).reshape(N, -1).sum(-1),
                               rtol=1e-5, atol=1e-5)

    # --- kernel 2: batched pairwise IoU (bf16 MXU, exact f32 divide) ---
    flat = np.asarray(ref_lprob).reshape(N, HW).astype(np.float32)
    iou = np.asarray(pairwise_mask_iou_batched(jnp.asarray(flat[None])))[0]
    ref_iou = (flat @ flat.T) / (flat.sum(-1, keepdims=True) + 1e-4)
    np.testing.assert_allclose(iou, ref_iou, rtol=2e-2, atol=1e-2)

    # --- full forward path ---
    results = mask_post_processor_forward(
        left_logits, right_logits, labels, boxes_per_image, scores,
        filter_empty=True, apply_mask_nms=True, mask_nms_thresh=0.9)
    jax.block_until_ready([r["mask"] for r in results])
    assert len(results) == len(boxes_per_image)
    for r in results:
        assert r["mask"].shape[1:] == (1, H, W)
        assert r["src_mask"].shape == r["mask"].shape
        assert r["scores"].shape[0] == r["mask"].shape[0]

    print("KERNEL_OK")
</pallas_src>

<mosaic_0001>
module attributes {stable_mosaic.version = 11 : i64} {
  func.func @_sigmoid_lr_kernel(%arg0: i32, %arg1: memref<8x256xf32, #tpu.memory_space<vmem>>, %arg2: memref<8x256xf32, #tpu.memory_space<vmem>>, %arg3: memref<8x256xf32, #tpu.memory_space<vmem>>, %arg4: memref<8x256xf32, #tpu.memory_space<vmem>>, %arg5: memref<8x1xf32, #tpu.memory_space<vmem>>, %arg6: memref<8x1xf32, #tpu.memory_space<vmem>>) attributes {dimension_semantics = [#tpu.dimension_semantics<parallel>], iteration_bounds = array<i64: 1>, scalar_prefetch = 0 : i64, scratch_operands = 0 : i64, tpu.core_type = #tpu.core_type<tc>, window_params = [{transform_indices = @transform_0, window_bounds = array<i64: 8, 256>}, {transform_indices = @transform_1, window_bounds = array<i64: 8, 256>}, {transform_indices = @transform_2, window_bounds = array<i64: 8, 256>}, {transform_indices = @transform_3, window_bounds = array<i64: 8, 256>}, {transform_indices = @transform_4, window_bounds = array<i64: 8, 1>}, {transform_indices = @transform_5, window_bounds = array<i64: 8, 1>}]} {
    %c0 = arith.constant 0 : index
    %c0_0 = arith.constant 0 : index
    %0 = vector.load %arg1[%c0, %c0_0] : memref<8x256xf32, #tpu.memory_space<vmem>>, vector<8x256xf32>
    %1 = arith.negf %0 : vector<8x256xf32>
    %2 = math.exp %1 : vector<8x256xf32>
    %cst = arith.constant 1.000000e+00 : f32
    %3 = vector.broadcast %cst : f32 to vector<8x256xf32>
    %4 = arith.addf %3, %2 : vector<8x256xf32>
    %5 = arith.divf %3, %4 : vector<8x256xf32>
    %c0_1 = arith.constant 0 : index
    %c0_2 = arith.constant 0 : index
    %6 = vector.load %arg2[%c0_1, %c0_2] : memref<8x256xf32, #tpu.memory_space<vmem>>, vector<8x256xf32>
    %7 = arith.negf %6 : vector<8x256xf32>
    %8 = math.exp %7 : vector<8x256xf32>
    %cst_3 = arith.constant 1.000000e+00 : f32
    %9 = vector.broadcast %cst_3 : f32 to vector<8x256xf32>
    %10 = arith.addf %9, %8 : vector<8x256xf32>
    %11 = arith.divf %9, %10 : vector<8x256xf32>
    %c0_4 = arith.constant 0 : index
    %c0_5 = arith.constant 0 : index
    %12 = vector.load %arg3[%c0_4, %c0_5] : memref<8x256xf32, #tpu.memory_space<vmem>>, vector<8x256xf32>
    tpu.vector_store %arg3[%c0_4, %c0_5], %5 {strides = array<i32>} : memref<8x256xf32, #tpu.memory_space<vmem>>, vector<8x256xf32>,
    %c0_6 = arith.constant 0 : index
    %c0_7 = arith.constant 0 : index
    %13 = vector.load %arg4[%c0_6, %c0_7] : memref<8x256xf32, #tpu.memory_space<vmem>>, vector<8x256xf32>
    tpu.vector_store %arg4[%c0_6, %c0_7], %11 {strides = array<i32>} : memref<8x256xf32, #tpu.memory_space<vmem>>, vector<8x256xf32>,
    %cst_8 = arith.constant dense<0.000000e+00> : vector<8xf32>
    %14 = vector.multi_reduction <add>, %5, %cst_8 [1] : vector<8x256xf32> to vector<8xf32>
    %15 = vector.shape_cast %14 : vector<8xf32> to vector<8x1xf32>
    %c0_9 = arith.constant 0 : index
    %c0_10 = arith.constant 0 : index
    %16 = vector.load %arg5[%c0_9, %c0_10] : memref<8x1xf32, #tpu.memory_space<vmem>>, vector<8x1xf32>
    tpu.vector_store %arg5[%c0_9, %c0_10], %15 {strides = array<i32>} : memref<8x1xf32, #tpu.memory_space<vmem>>, vector<8x1xf32>,
    %cst_11 = arith.constant dense<0.000000e+00> : vector<8xf32>
    %17 = vector.multi_reduction <add>, %11, %cst_11 [1] : vector<8x256xf32> to vector<8xf32>
    %18 = vector.shape_cast %17 : vector<8xf32> to vector<8x1xf32>
    %c0_12 = arith.constant 0 : index
    %c0_13 = arith.constant 0 : index
    %19 = vector.load %arg6[%c0_12, %c0_13] : memref<8x1xf32, #tpu.memory_space<vmem>>, vector<8x1xf32>
    tpu.vector_store %arg6[%c0_12, %c0_13], %18 {strides = array<i32>} : memref<8x1xf32, #tpu.memory_space<vmem>>, vector<8x1xf32>,
    return
  }
  func.func @transform_0(%arg0: i32) -> (i32, i32) {
    %c0_i32 = arith.constant 0 : i32
    %c0_i32_0 = arith.constant 0 : i32
    return %arg0, %c0_i32 : i32, i32
  }
  func.func @transform_1(%arg0: i32) -> (i32, i32) {
    %c0_i32 = arith.constant 0 : i32
    %c0_i32_0 = arith.constant 0 : i32
    return %arg0, %c0_i32 : i32, i32
  }
  func.func @transform_2(%arg0: i32) -> (i32, i32) {
    %c0_i32 = arith.constant 0 : i32
    %c0_i32_0 = arith.constant 0 : i32
    return %arg0, %c0_i32 : i32, i32
  }
  func.func @transform_3(%arg0: i32) -> (i32, i32) {
    %c0_i32 = arith.constant 0 : i32
    %c0_i32_0 = arith.constant 0 : i32
    return %arg0, %c0_i32 : i32, i32
  }
  func.func @transform_4(%arg0: i32) -> (i32, i32) {
    %c0_i32 = arith.constant 0 : i32
    %c0_i32_0 = arith.constant 0 : i32
    return %arg0, %c0_i32 : i32, i32
  }
  func.func @transform_5(%arg0: i32) -> (i32, i32) {
    %c0_i32 = arith.constant 0 : i32
    %c0_i32_0 = arith.constant 0 : i32
    return %arg0, %c0_i32 : i32, i32
  }
}

</mosaic_0001>

<bundles_post_ra>
// kernel: tpu_custom_call.1
= control target key start
LH: loop header
LB: loop body
LE: loop exit
PB: predicated region body
PF: predicated region fallthrough
CT: control target
= control target key end

     0   :  { %11 = vsyncpa [#allocation3], 0  ;;  %s328_s0 = inlined_call_operand.hbm [shape: f32[8,256], index: 0, kind: input, shape index: {}]   ;;  %s329_s1 = inlined_call_operand.hbm [shape: f32[8,256], index: 1, kind: input, shape index: {}]   ;;  %s330_s2 = inlined_call_operand.hbm [shape: f32[8,256], index: 2, kind: output, shape index: {0}]   ;;  %s331_s3 = inlined_call_operand.hbm [shape: f32[8,256], index: 3, kind: output, shape index: {1}]   ;;  %s332_s4 = inlined_call_operand.vmem [shape: f32[8,1], index: 4, kind: output, shape index: {2}]   ;;  %s333_s5 = inlined_call_operand.vmem [shape: f32[8,1], index: 5, kind: output, shape index: {3}]  }
   0x1   :  { %12 = vsyncpa [#allocation6], 0 }
   0x2   :  { %13 = vsyncpa [#allocation4], 0 }
   0x3   :  { %14 = vsyncpa [#allocation9], 0  ;;  %s240_s18 = smov [#allocation2]   ;;  %s241_s20 = smov [#allocation5]  }
   0x4   :  { %s21_s19 = sshll.u32 %s240_s18, 4  ;;  %s31_s21 = sshll.u32 %s241_s20, 4  ;;  %s22_s19 = int_to_ptr.vmem [resolvable:$true] %s21_s19  ;;  %s32_s21 = int_to_ptr.vmem [resolvable:$true] %s31_s21 }
   0x5   :  { %s144_s24 = scalar_lea.hbm %s328_s0, 256 }
   0x6   :  { %p145_p0 = scmp.ne.s32.totalorder %s328_s0, %s144_s24  ;;  %p148_p1 = scmp.lt.u32.totalorder %s144_s24, %s328_s0 }
   0x8   :  { %p150_p2 = pnand %p148_p1, %p145_p0 }
   0xa   :  { %153 = shalt.err (!%p150_p2)
}
   0xb   :  { %s154_s29 = scalar_lea.vmem %s22_s19, 256  ;;  %p159_p4 = scmp.lt.s32.totalorder %s22_s19, %s22_s19 }
   0xc   :  { %p155_p3 = scmp.ne.s32.totalorder %s22_s19, %s154_s29  ;;  %p160_p5 = scmp.lt.s32.totalorder %s154_s29, %s154_s29 }
   0xe   :  { %p161_p6 = por %p160_p5, %p159_p4 }
  0x10   :  { %p162_p7 = pnand %p161_p6, %p155_p3 }
  0x12   :  { %165 = shalt.err (!%p162_p7)
}
  0x13   :  { %24 = dma.hbm_to_vmem [thread:$0]  %s328_s0, 256, %s22_s19, [#allocation3]  }
  0x14   :  { %s166_s9 = scalar_lea.hbm %s329_s1, 256 }
  0x15   :  { %p167_p8 = scmp.ne.s32.totalorder %s329_s1, %s166_s9  ;;  %p170_p9 = scmp.lt.u32.totalorder %s166_s9, %s329_s1 }
  0x17   :  { %p172_p10 = pnand %p170_p9, %p167_p8 }
  0x19   :  { %175 = shalt.err (!%p172_p10)
}
  0x1a   :  { %s176_s14 = scalar_lea.vmem %s32_s21, 256  ;;  %p181_p12 = scmp.lt.s32.totalorder %s32_s21, %s32_s21 }
  0x1b   :  { %p177_p11 = scmp.ne.s32.totalorder %s32_s21, %s176_s14  ;;  %p182_p13 = scmp.lt.s32.totalorder %s176_s14, %s176_s14 }
  0x1d   :  { %p183_p0 = por %p182_p13, %p181_p12 }
  0x1f   :  { %p184_p1 = pnand %p183_p0, %p177_p11 }
  0x21   :  { %187 = shalt.err (!%p184_p1)
}
  0x22   :  { %34 = dma.hbm_to_vmem [thread:$0]  %s329_s1, 256, %s32_s21, [#allocation6]  }
  0x23   :  { %232 = dma.done.wait [#allocation3], 256  }
  0x24   :  { %233 = vsyncadd [#allocation3], 4294967040 }
  0x25   :  { %234 = dma.done.wait [#allocation6], 256  }
  0x26   :  { %235 = vsyncadd [#allocation6], 4294967040  ;;  %v41_v0 = vld [vmem:[#allocation2] sm:$0xff]  ;;  %v42_v1 = vld [vmem:[#allocation2 + $0x8] sm:$0xff]  ;;  %s242_s1 = smov [#allocation7]   ;;  %s243_s17 = smov [#allocation8]  }
  0x27   :  { %v55_v2 = vld [vmem:[#allocation5] sm:$0xff]  ;;  %v120_v3 = vmul.f32 -1.442695, %v41_v0  ;;  %v121_v4 = vmul.f32 -1.442695, %v42_v1  ;;  %v56_v5 = vld [vmem:[#allocation5 + $0x8] sm:$0xff] }
  0x28   :  { %v122_v6 = vmul.f32 -1.442695, %v55_v2  ;;  %v123_v7 = vmul.f32 -1.442695, %v56_v5  ;;  %s88_s16 = sshll.u32 %s242_s1, 4  ;;  %s98_s18 = sshll.u32 %s243_s17, 4  ;;  %s89_s16 = int_to_ptr.vmem [resolvable:$true] %s88_s16  ;;  %s99_s18 = int_to_ptr.vmem [resolvable:$true] %s98_s18 }
  0x29   :  { %128 = vpow2.f32 %v120_v3  ;;  %s188_s19 = scalar_lea.vmem %s89_s16, 256  ;;  %p193_p3 = scmp.lt.s32.totalorder %s89_s16, %s89_s16 }
  0x2a   :  { %130 = vpow2.f32 %v121_v4  ;;  %p189_p2 = scmp.ne.s32.totalorder %s89_s16, %s188_s19  ;;  %p194_p4 = scmp.lt.s32.totalorder %s188_s19, %s188_s19 }
  0x2b   :  { %132 = vpow2.f32 %v122_v6 }
  0x2c   :  { %134 = vpow2.f32 %v123_v7  ;;  %p195_p5 = por %p194_p4, %p193_p3 }
  0x2e   :  { %p196_p6 = pnand %p195_p5, %p189_p2 }
  0x33   :  { %v129_v8 = vpop.eup %128 }
  0x34   :  { %v131_v9 = vpop.eup %130  ;;  %v49_v10 = vadd.f32 1.0, %v129_v8 }
  0x35   :  { %v133_v11 = vpop.eup %132  ;;  %v50_v12 = vadd.f32 1.0, %v131_v9 }
  0x36   :  { %v135_v13 = vpop.eup %134  ;;  %136 = vrcp.f32 %v49_v10  ;;  %v63_v14 = vadd.f32 1.0, %v133_v11 }
  0x37   :  { %138 = vrcp.f32 %v50_v12  ;;  %v64_v15 = vadd.f32 1.0, %v135_v13 }
  0x38   :  { %140 = vrcp.f32 %v63_v14 }
  0x39   :  { %142 = vrcp.f32 %v64_v15 }
  0x40   :  { %v137_v16 = vpop.eup %136 }
  0x41   :  { %v139_v17 = vpop.eup %138  ;;  %69 = vst [vmem:[#allocation7] sm:$0xff] %v137_v16 }
  0x42   :  { %v141_v18 = vpop.eup %140  ;;  %v73_v19 = vadd.f32 %v139_v17, %v137_v16  ;;  %70 = vst [vmem:[#allocation7 + $0x8] sm:$0xff] %v139_v17 }
  0x43   :  { %v143_v20 = vpop.eup %142  ;;  %71 = vst [vmem:[#allocation8] sm:$0xff] %v141_v18 }
  0x44   :  { %74 = vadd.xlane.f32.xlu0 %v73_v19  ;;  %v78_v21 = vadd.f32 %v143_v20, %v141_v18  ;;  %72 = vst [vmem:[#allocation8 + $0x8] sm:$0xff] %v143_v20 }
  0x48   :  { %79 = vadd.xlane.f32.xlu0 %v78_v21 }
  0x49   :  { %199 = shalt.err (!%p196_p6)
}
  0x4a   :  { %s200_s22 = scalar_lea.hbm %s330_s2, 256 }
  0x4b   :  { %p201_p7 = scmp.ne.s32.totalorder %s330_s2, %s200_s22  ;;  %p204_p8 = scmp.lt.u32.totalorder %s200_s22, %s330_s2 }
  0x4d   :  { %p206_p9 = pnand %p204_p8, %p201_p7 }
  0x4f   :  { %209 = shalt.err (!%p206_p9)
}
  0x50   :  { %91 = dma.vmem_to_hbm [thread:$0]  %s89_s16, 256, %s330_s2, [#allocation4]  }
  0x51   :  { %s210_s29 = scalar_lea.vmem %s99_s18, 256  ;;  %p215_p11 = scmp.lt.s32.totalorder %s99_s18, %s99_s18 }
  0x52   :  { %p211_p10 = scmp.ne.s32.totalorder %s99_s18, %s210_s29  ;;  %p216_p12 = scmp.lt.s32.totalorder %s210_s29, %s210_s29 }
  0x54   :  { %p217_p13 = por %p216_p12, %p215_p11 }
  0x56   :  { %p218_p0 = pnand %p217_p13, %p211_p10 }
  0x58   :  { %221 = shalt.err (!%p218_p0)
}
  0x59   :  { %s222_s7 = scalar_lea.hbm %s331_s3, 256 }
  0x5a   :  { %p223_p1 = scmp.ne.s32.totalorder %s331_s3, %s222_s7  ;;  %p226_p2 = scmp.lt.u32.totalorder %s222_s7, %s331_s3 }
  0x5c   :  { %p228_p3 = pnand %p226_p2, %p223_p1 }
  0x5e   :  { %231 = shalt.err (!%p228_p3)
}
  0x5f   :  { %101 = dma.vmem_to_hbm [thread:$0]  %s99_s18, 256, %s331_s3, [#allocation9]   ;;  %vm76_vm0 = vcmask 7168  }
  0xd1   :  { %v75_v22 = vpop.xlane.xlu0 %74 }
  0xd2   :  { %77 = vst.msk [vmem:[%s332_s4] sm:$0xff] %vm76_vm0, %v75_v22 }
  0xd5   :  { %v80_v23 = vpop.xlane.xlu0 %79 }
  0xd6   :  { %81 = vst.msk [vmem:[%s333_s5] sm:$0xff] %vm76_vm0, %v80_v23 }
  0xd7   :  { %236 = dma.done.wait [#allocation4], 256  }
  0xd8   :  { %237 = vsyncadd [#allocation4], 4294967040 }
  0xd9   :  { %238 = dma.done.wait [#allocation9], 256  }
  0xda   :  { %239 = vsyncadd [#allocation9], 4294967040 }
  0xdb   :  { %116 = vsyncpa [#allocation3], 1 }
  0xdc   :  { %117 = vsyncpa [#allocation6], 1 }
  0xdd   :  { %118 = vsyncpa [#allocation4], 1 }
  0xde   :  { %119 = vsyncpa [#allocation9], 1 }

</bundles_post_ra>
